<compile_context>
chip_gen: v6e
topology: v6e:2x2x1
jax: 0.10.0
libtpu: 0.0.40
codegen_flags: <defaults>
</compile_context>

<pallas_src>
import jax
import jax.numpy as jnp
from jax.experimental import pallas as pl
from jax.experimental.pallas import tpu as pltpu


def _nlinear_blockdiag_kernel(x_ref, w_ref, b_ref, o_ref):
    # x_ref: (TB, n*d_in), w_ref: (n*d_in, n*d_out), b_ref: (1, n*d_out),
    # o_ref: (TB, n*d_out).  One lane-dense MXU matmul per grid step.
    acc = jnp.dot(x_ref[...], w_ref[...], preferred_element_type=jnp.float32)
    o_ref[...] = (acc + b_ref[...]).astype(o_ref.dtype)


def _nlinear_unrolled_kernel(x_ref, w_ref, b_ref, o_ref):
    # x_ref: (TB, n*d_in), w_ref: (n, d_in, d_out), b_ref: (1, n*d_out),
    # o_ref: (TB, n*d_out).  n is small & static -> unrolls into n MXU dots feeding
    # one wide, lane-dense store.
    n, d_in, d_out = w_ref.shape
    cols = [
        jnp.dot(
            x_ref[:, i * d_in:(i + 1) * d_in],
            w_ref[i],
            preferred_element_type=jnp.float32,
        )
        for i in range(n)
    ]
    acc = jnp.concatenate(cols, axis=-1) + b_ref[...]   # (TB, n*d_out), f32 accumulate
    o_ref[...] = acc.astype(o_ref.dtype)


def _pick_block_b(B, n, d_in, d_out, itemsize, vmem_budget_bytes):
    """Largest batch tile whose double-buffered in+out slabs fit the VMEM budget."""
    bytes_per_row = 2 * n * (d_in + d_out) * itemsize   # x tile + out tile, 2 buffers each
    tb = max(vmem_budget_bytes // max(bytes_per_row, 1), 8)
    tb = min(tb, 2048)
    if tb >= B:
        return B                       # single step, full-extent block
    return max((tb // 8) * 8, 8)       # keep the sublane (row) dim a multiple of 8


def nlinear_forward(x, weights, biases, *, block_b=None, use_block_diag=None):
    """x: [B, n, d_in], weights: [n, d_in, d_out], biases: [n, d_out] -> [B, n, d_out]."""
    B, n, d_in = x.shape
    d_out = weights.shape[-1]
    x_itemsize = jnp.dtype(x.dtype).itemsize
    w_itemsize = jnp.dtype(weights.dtype).itemsize

    if use_block_diag is None:
        # Fast path only when the folded block-diagonal weight stays small: the extra
        # zero FLOPs are then hidden under MXU tile granularity and we're mem-bound on
        # activations anyway.
        bd_bytes = n * d_in * n * d_out * w_itemsize
        use_block_diag = (n * d_in <= 1024) and (n * d_out <= 1024) and bd_bytes <= (4 << 20)

    resident_w_bytes = (n * d_in * n * d_out if use_block_diag
                        else n * d_in * d_out) * w_itemsize
    resident_b_bytes = n * d_out * 4

    if block_b is None:
        # ~20 MiB of double-buffered activation tiles after reserving space for the
        # VMEM-resident weights/bias: comfortably under v7x's 64 MiB physical VMEM,
        # and big enough to sit near the HBM roofline on all gens.
        budget = max((20 << 20) - resident_w_bytes - resident_b_bytes, 1 << 20)
        block_b = _pick_block_b(B, n, d_in, d_out, x_itemsize, budget)

    grid_b = pl.cdiv(B, block_b)
    b_pad = grid_b * block_b

    x_flat = x.reshape(B, n * d_in)                 # contiguous reshape: no HBM copy
    if b_pad != B:                                  # pad batch tail; sliced off below
        x_flat = jnp.pad(x_flat, ((0, b_pad - B), (0, 0)))
    b_flat = biases.reshape(1, n * d_out).astype(jnp.float32)   # cast once, not per step

    if use_block_diag:
        # Fold the n weight matrices into one block-diagonal matrix (built once,
        # tiny for the sizes this path handles).
        eye = jnp.eye(n, dtype=weights.dtype)
        w_arg = jnp.einsum("ij,iab->iajb", eye, weights).reshape(n * d_in, n * d_out)
        w_spec = pl.BlockSpec((n * d_in, n * d_out), lambda b: (0, 0))   # resident
        kernel = _nlinear_blockdiag_kernel
    else:
        w_arg = weights
        w_spec = pl.BlockSpec((n, d_in, d_out), lambda b: (0, 0, 0))     # resident
        kernel = _nlinear_unrolled_kernel

    out_flat = pl.pallas_call(
        kernel,
        out_shape=jax.ShapeDtypeStruct((b_pad, n * d_out), x.dtype),
        grid_spec=pltpu.PrefetchScalarGridSpec(
            num_scalar_prefetch=0,
            grid=(grid_b,),
            in_specs=[
                pl.BlockSpec((block_b, n * d_in), lambda b: (b, 0)),      # activations
                w_spec,                                                   # weights: resident
                pl.BlockSpec((1, n * d_out), lambda b: (0, 0)),           # bias: resident
            ],
            out_specs=pl.BlockSpec((block_b, n * d_out), lambda b: (b, 0)),
        ),
        compiler_params=pltpu.CompilerParams(
            dimension_semantics=("parallel",),      # independent B tiles -> megacore
            vmem_limit_bytes=48 * 1024 * 1024,
        ),
    )(x_flat, w_arg, b_flat)

    return out_flat[:B].reshape(B, n, d_out)        # contiguous reshape: no HBM copy


def init_nlinear_params(key, n, d_in, d_out, dtype=jnp.float32):
    """Deterministic synthetic init with nn.Linear-style uniform bounds."""
    kw, kb = jax.random.split(key)
    bound = 1.0 / (d_in ** 0.5)
    weights = jax.random.uniform(kw, (n, d_in, d_out), dtype, -bound, bound)
    biases = jax.random.uniform(kb, (n, d_out), dtype, -bound, bound)
    return weights, biases


if __name__ == "__main__":
    B, n, d_in, d_out = 2, 4, 32, 16

    key = jax.random.PRNGKey(0)
    kx, kx2, kp = jax.random.split(key, 3)
    x = jax.random.normal(kx, (B, n, d_in), dtype=jnp.float32)
    weights, biases = init_nlinear_params(kp, n, d_in, d_out)

    # reference: per-position linear, same semantics as the PyTorch module
    ref = jnp.einsum("bnd,nde->bne", x, weights) + biases[None, :, :]

    # fast path (block-diagonal single matmul)
    out = jax.block_until_ready(nlinear_forward(x, weights, biases))
    assert out.shape == (B, n, d_out)
    assert jnp.allclose(out, ref, atol=1e-4, rtol=1e-4)

    # fallback path (unrolled per-position dots) + multi-step grid + padded batch tail
    B2 = 13
    x2 = jax.random.normal(kx2, (B2, n, d_in), dtype=jnp.float32)
    ref2 = jnp.einsum("bnd,nde->bne", x2, weights) + biases[None, :, :]
    out2 = jax.block_until_ready(
        nlinear_forward(x2, weights, biases, block_b=8, use_block_diag=False)
    )
    assert out2.shape == (B2, n, d_out)
    assert jnp.allclose(out2, ref2, atol=1e-4, rtol=1e-4)

    print("KERNEL_OK")
</pallas_src>

<mosaic_0001>
module attributes {stable_mosaic.version = 11 : i64} {
  func.func @_nlinear_blockdiag_kernel(%arg0: i32, %arg1: memref<2x128xf32, #tpu.memory_space<vmem>>, %arg2: memref<128x64xf32, #tpu.memory_space<vmem>>, %arg3: memref<1x64xf32, #tpu.memory_space<vmem>>, %arg4: memref<2x64xf32, #tpu.memory_space<vmem>>) attributes {dimension_semantics = [#tpu.dimension_semantics<parallel>], iteration_bounds = array<i64: 1>, scalar_prefetch = 0 : i64, scratch_operands = 0 : i64, tpu.core_type = #tpu.core_type<tc>, window_params = [{transform_indices = @transform_0, window_bounds = array<i64: 2, 128>}, {pipeline_mode = #tpu.pipeline_mode<synchronous>, transform_indices = @transform_1, window_bounds = array<i64: 128, 64>}, {pipeline_mode = #tpu.pipeline_mode<synchronous>, transform_indices = @transform_2, window_bounds = array<i64: 1, 64>}, {transform_indices = @transform_3, window_bounds = array<i64: 2, 64>}]} {
    %c0 = arith.constant 0 : index
    %c0_0 = arith.constant 0 : index
    %0 = vector.load %arg1[%c0, %c0_0] : memref<2x128xf32, #tpu.memory_space<vmem>>, vector<2x128xf32>
    %c0_1 = arith.constant 0 : index
    %c0_2 = arith.constant 0 : index
    %1 = vector.load %arg2[%c0_1, %c0_2] : memref<128x64xf32, #tpu.memory_space<vmem>>, vector<128x64xf32>
    %cst = arith.constant dense<0.000000e+00> : vector<2x64xf32>
    %2 = tpu.matmul %0, %1, %cst {dimension_numbers = #tpu.dot_dimension_numbers<[1], [0], [0], [1], [0, 0, 1, 1], [], []>} : vector<2x128xf32>, vector<128x64xf32>, vector<2x64xf32> -> vector<2x64xf32>
    %c0_3 = arith.constant 0 : index
    %c0_4 = arith.constant 0 : index
    %3 = vector.load %arg3[%c0_3, %c0_4] : memref<1x64xf32, #tpu.memory_space<vmem>>, vector<1x64xf32>
    %4 = vector.broadcast %3 : vector<1x64xf32> to vector<2x64xf32>
    %5 = arith.addf %2, %4 : vector<2x64xf32>
    %c0_5 = arith.constant 0 : index
    %c0_6 = arith.constant 0 : index
    %6 = vector.load %arg4[%c0_5, %c0_6] : memref<2x64xf32, #tpu.memory_space<vmem>>, vector<2x64xf32>
    tpu.vector_store %arg4[%c0_5, %c0_6], %5 {strides = array<i32>} : memref<2x64xf32, #tpu.memory_space<vmem>>, vector<2x64xf32>,
    return
  }
  func.func @transform_0(%arg0: i32) -> (i32, i32) {
    %c0_i32 = arith.constant 0 : i32
    %c0_i32_0 = arith.constant 0 : i32
    return %arg0, %c0_i32 : i32, i32
  }
  func.func @transform_1(%arg0: i32) -> (i32, i32) {
    %c0_i32 = arith.constant 0 : i32
    %c0_i32_0 = arith.constant 0 : i32
    %c0_i32_1 = arith.constant 0 : i32
    return %c0_i32, %c0_i32_0 : i32, i32
  }
  func.func @transform_2(%arg0: i32) -> (i32, i32) {
    %c0_i32 = arith.constant 0 : i32
    %c0_i32_0 = arith.constant 0 : i32
    %c0_i32_1 = arith.constant 0 : i32
    return %c0_i32, %c0_i32_0 : i32, i32
  }
  func.func @transform_3(%arg0: i32) -> (i32, i32) {
    %c0_i32 = arith.constant 0 : i32
    %c0_i32_0 = arith.constant 0 : i32
    return %arg0, %c0_i32 : i32, i32
  }
}

</mosaic_0001>

<bundles_post_ra>
// kernel: tpu_custom_call.1
= control target key start
LH: loop header
LB: loop body
LE: loop exit
PB: predicated region body
PF: predicated region fallthrough
CT: control target
= control target key end

     0   :  { %v203_v1 = vmov 0.0   ;;  %vm204_vm0 = vmmov 0   ;;  %s283_s0 = inlined_call_operand.vmem [shape: f32[2,128], index: 0, kind: input, shape index: {}]   ;;  %s284_s1 = inlined_call_operand.vmem [shape: f32[128,64], index: 1, kind: input, shape index: {}]   ;;  %s285_s2 = inlined_call_operand.vmem [shape: f32[1,64], index: 2, kind: input, shape index: {}]   ;;  %s286_s3 = inlined_call_operand.hbm [shape: f32[2,64], index: 3, kind: output, shape index: {}]  }
   0x1   :  { %v31_v0 = vld [vmem:[%s284_s1 + $0x78] sm:$0xff]  ;;  %143 = vmatprep.subr.mxu0 %v203_v1  ;;  %v30_v2 = vld [vmem:[%s284_s1 + $0x70] sm:$0xff]  ;;  %175 = vmatprep.mubr.msk.f32.mxu0 %vm204_vm0, %v203_v1  ;;  %v29_v3 = vld [vmem:[%s284_s1 + $0x68] sm:$0xff] }
   0x2   :  { %144 = vmatpush3.msra.mxu0 %v31_v0  ;;  %v28_v4 = vld [vmem:[%s284_s1 + $0x60] sm:$0xff] }
   0x3   :  { %145 = vmatprep.subr.mxu0 %v203_v1 }
   0x4   :  { %146 = vmatpush3.msra.mxu0 %v30_v2 }
   0x5   :  { %147 = vmatprep.subr.mxu0 %v203_v1 }
   0x6   :  { %148 = vmatpush3.msra.mxu0 %v29_v3 }
   0x7   :  { %8 = vsyncpa [#allocation3], 0  ;;  %149 = vmatprep.subr.mxu0 %v203_v1  ;;  %v27_v5 = vld [vmem:[%s284_s1 + $0x58] sm:$0xff]  ;;  %v26_v6 = vld [vmem:[%s284_s1 + $0x50] sm:$0xff]  ;;  %s205_s21 = smov [#allocation2]   ;;  %vm109_vm1 = vcmask 517120  }
   0x8   :  { %150 = vmatpush3.msra.mxu0 %v28_v4  ;;  %v25_v7 = vld [vmem:[%s284_s1 + $0x48] sm:$0xff]  ;;  %v24_v8 = vld [vmem:[%s284_s1 + $0x40] sm:$0xff]  ;;  %v23_v9 = vld [vmem:[%s284_s1 + $0x38] sm:$0xff]  ;;  %s117_s22 = sshll.u32 %s205_s21, 4  ;;  %s118_s22 = int_to_ptr.vmem [resolvable:$true] %s117_s22 }
   0x9   :  { %151 = vmatprep.subr.mxu0 %v203_v1  ;;  %v22_v10 = vld [vmem:[%s284_s1 + $0x30] sm:$0xff]  ;;  %v21_v11 = vld [vmem:[%s284_s1 + $0x28] sm:$0xff]  ;;  %v20_v12 = vld [vmem:[%s284_s1 + $0x20] sm:$0xff]  ;;  %p186_p1 = scmp.lt.s32.totalorder %s118_s22, %s118_s22 }
   0xa   :  { %152 = vmatpush3.msra.mxu0 %v27_v5  ;;  %v19_v13 = vld [vmem:[%s284_s1 + $0x18] sm:$0xff]  ;;  %v18_v14 = vld [vmem:[%s284_s1 + $0x10] sm:$0xff]  ;;  %v17_v15 = vld [vmem:[%s284_s1 + $0x8] sm:$0xff] }
   0xb   :  { %153 = vmatprep.subr.mxu0 %v203_v1  ;;  %v16_v16 = vld [vmem:[%s284_s1] sm:$0xff]  ;;  %s181_s1 = scalar_lea.vmem %s118_s22, 32 }
   0xc   :  { %154 = vmatpush3.msra.mxu0 %v26_v6  ;;  %v15_v17 = vld [vmem:[%s283_s0] sm:$0x3]  ;;  %p182_p0 = scmp.ne.s32.totalorder %s118_s22, %s181_s1  ;;  %p187_p2 = scmp.lt.s32.totalorder %s181_s1, %s181_s1 }
   0xd   :  { %155 = vmatprep.subr.mxu0 %v203_v1  ;;  %v125_v18 = vld [vmem:[%s285_s2] ss:$0 sm:$0xff] }
   0xe   :  { %156 = vmatpush3.msra.mxu0 %v25_v7  ;;  %p188_p3 = por %p187_p2, %p186_p1 }
   0xf   :  { %157 = vmatprep.subr.mxu0 %v203_v1 }
  0x10   :  { %158 = vmatpush3.msra.mxu0 %v24_v8  ;;  %p189_p4 = pnand %p188_p3, %p182_p0 }
  0x11   :  { %159 = vmatprep.subr.mxu0 %v203_v1 }
  0x12   :  { %160 = vmatpush3.msra.mxu0 %v23_v9 }
  0x13   :  { %161 = vmatprep.subr.mxu0 %v203_v1 }
  0x14   :  { %162 = vmatpush3.msra.mxu0 %v22_v10 }
  0x15   :  { %163 = vmatprep.subr.mxu0 %v203_v1 }
  0x16   :  { %164 = vmatpush3.msra.mxu0 %v21_v11 }
  0x17   :  { %165 = vmatprep.subr.mxu0 %v203_v1 }
  0x18   :  { %166 = vmatpush3.msra.mxu0 %v20_v12 }
  0x19   :  { %167 = vmatprep.subr.mxu0 %v203_v1 }
  0x1a   :  { %168 = vmatpush3.msra.mxu0 %v19_v13 }
  0x1b   :  { %169 = vmatprep.subr.mxu0 %v203_v1 }
  0x1c   :  { %170 = vmatpush3.msra.mxu0 %v18_v14 }
  0x1d   :  { %171 = vmatprep.subr.mxu0 %v203_v1 }
  0x1e   :  { %172 = vmatpush3.msra.mxu0 %v17_v15 }
  0x1f   :  { %173 = vmatprep.subr.mxu0 %v203_v1 }
  0x20   :  { %174 = vmatpush3.msra.mxu0 %v16_v16 }
  0x21   :  { %176 = vmatmul.mubr.f32.vlgmr.msra.gmra.mxu0 %v15_v17 }
  0xe1   :  { %v105_v19 = vpop.f32.mrf.mxu0 }
  0xe2   :  { %v106_v20 = vadd.f32 %v125_v18, %v105_v19 }
  0xe3   :  { %v177_v21 = vpop.f32.mrf.mxu0 }
  0xe4   :  { %110 = vst.msk [vmem:[#allocation2] sm:$0x3] %vm109_vm1, %v106_v20 }
  0xe5   :  { %192 = shalt.err (!%p189_p4)
}
  0xe6   :  { %120 = dma.vmem_to_hbm [thread:$0]  %s118_s22, 32, %s286_s3, [#allocation3]  }
  0xe7   :  { %201 = dma.done.wait [#allocation3], 32  }
  0xe8   :  { %202 = vsyncadd [#allocation3], 4294967264 }
  0xe9   :  { %124 = vsyncpa [#allocation3], 1 }

</bundles_post_ra>
